<compile_context>
chip_gen: v7x
topology: tpu7x:2x2x1
jax: 0.10.0
libtpu: 0.0.40
codegen_flags: <defaults>
</compile_context>

<pallas_src>
import math

import jax
import jax.numpy as jnp
import numpy as np
from jax.experimental import pallas as pl
from jax.experimental.pallas import tpu as pltpu


def _round_up(a, b):
    return ((a + b - 1) // b) * b


def _cdiv(a, b):
    return (a + b - 1) // b


def scale_kernel(x_ref, s_ref, o_ref):
    # (tr, wb) * (1, wb): scale broadcasts along the sublane axis; pure VPU work.
    o_ref[...] = x_ref[...] * s_ref[...]


def _block_bytes_for_device():
    """Per-block byte budget. Per-step VMEM ~= 4x block (double-buffered x + out),
    which must fit the default scoped VMEM (16 MiB v5e, 32 MiB v6e/v7x)."""
    try:
        kind = jax.devices()[0].device_kind.lower()
    except Exception:
        kind = ""
    if "v5 lite" in kind or "v5e" in kind or "v5lite" in kind:
        return 3 << 20          # 4 x 3 MiB = 12 MiB  < 16 MiB
    if "v6" in kind:
        return 4 << 20          # 4 x 4 MiB = 16 MiB  < 32 MiB
    if "v7" in kind:
        return 6 << 20          # 4 x 6 MiB = 24 MiB  < 32 MiB (amortize 0.35us/step @ 3.2 TB/s)
    return 3 << 20              # unknown: be conservative


def scale_forward(x, scale, *, block_bytes=None, max_pack_lanes=1024,
                  max_lane_block=2048):
    """out = x * scale, with scale of shape (dim,) broadcast over the last dim of x."""
    orig_shape = x.shape
    dim = int(orig_shape[-1])
    assert scale.shape == (dim,), f"scale must have shape ({dim},), got {scale.shape}"

    rows = 1
    for d in orig_shape[:-1]:
        rows *= int(d)

    scale = scale.astype(x.dtype)
    x2 = x.reshape(rows, dim)

    itemsize = jnp.dtype(x.dtype).itemsize
    sub = max(8, 32 // itemsize)      # sublane packing: 8 (f32) / 16 (bf16) / 32 (int8)

    # Lane packing: p = lcm(dim,128)/dim consecutive tokens per stored row keeps the
    # output lane-dense (width a multiple of 128 -> unmasked vst) for every dim.
    p = 128 // math.gcd(dim, 128)
    if dim * p > max_pack_lanes:
        # TODO(synk): dims whose lcm with 128 is huge (e.g. 65, 100) fall back to
        # masked stores rather than an excessive packing / token-padding factor.
        p = 1
    width = dim * p

    # Pad only the token remainder the packing reshape strictly requires (no
    # tile-rounding pad of the whole tensor, no output slice in the common case).
    rows_p = _round_up(rows, p)
    if rows_p != rows:
        x2 = jnp.pad(x2, ((0, rows_p - rows), (0, 0)))
    r_packed = rows_p // p
    xp = x2.reshape(r_packed, width)
    sp = (jnp.tile(scale, p) if p > 1 else scale).reshape(1, width)

    # Lane-axis block: full width when small, otherwise 128-aligned blocks
    # (Pallas clips the partial edge block).
    if width <= max_lane_block:
        wb = width
    else:
        wb = (max_lane_block // 128) * 128

    # Row-axis block from the per-generation byte budget.
    if block_bytes is None:
        block_bytes = _block_bytes_for_device()
    tr = max(sub, (block_bytes // (wb * itemsize)) // sub * sub)
    tr = min(tr, _round_up(r_packed, sub))

    # Megacore (v7x): make sure the grid has >= 2 steps when the data allows it.
    if _cdiv(r_packed, tr) * _cdiv(width, wb) < 2 and r_packed > sub:
        tr = max(sub, _round_up(_cdiv(r_packed, 2), sub))

    grid = (_cdiv(r_packed, tr), _cdiv(width, wb))

    total = rows * dim
    cost = pl.CostEstimate(
        flops=total,
        transcendentals=0,
        bytes_accessed=2 * total * itemsize + dim * itemsize,
    )

    out = pl.pallas_call(
        scale_kernel,
        out_shape=jax.ShapeDtypeStruct((r_packed, width), x.dtype),
        grid_spec=pltpu.PrefetchScalarGridSpec(
            num_scalar_prefetch=0,
            grid=grid,
            in_specs=[
                pl.BlockSpec((tr, wb), lambda i, j: (i, j)),   # x rows (pipelined)
                pl.BlockSpec((1, wb), lambda i, j: (0, j)),    # scale (VMEM-resident)
            ],
            out_specs=pl.BlockSpec((tr, wb), lambda i, j: (i, j)),
        ),
        compiler_params=pltpu.CompilerParams(
            dimension_semantics=("parallel", "parallel")),
        cost_estimate=cost,
    )(xp, sp)

    out = out.reshape(rows_p, dim)
    if rows_p != rows:
        out = out[:rows]
    return out.reshape(orig_shape)


if __name__ == "__main__":
    key = jax.random.PRNGKey(0)
    kx, ks, kx2, ks2 = jax.random.split(key, 4)

    # Main small-shape check: batch=2, tokens=8, dim=64 (dim packs 2 tokens -> 128 lanes).
    B, N, D = 2, 8, 64
    x = jax.random.normal(kx, (B, N, D), dtype=jnp.float32)
    scale = 1.0 + 0.1 * jax.random.normal(ks, (D,), dtype=jnp.float32)

    out = jax.block_until_ready(scale_forward(x, scale))
    ref = x * scale
    np.testing.assert_allclose(np.asarray(out), np.asarray(ref), rtol=1e-6, atol=1e-6)

    # Extra check exercising the non-128-divisible dim + remainder-row path.
    B2, N2, D2 = 1, 5, 96       # gcd(96,128)=32 -> p=4, width=384; 5 rows -> pad to 8
    x2 = jax.random.normal(kx2, (B2, N2, D2), dtype=jnp.float32)
    scale2 = 1.0 + 0.1 * jax.random.normal(ks2, (D2,), dtype=jnp.float32)
    out2 = jax.block_until_ready(scale_forward(x2, scale2))
    np.testing.assert_allclose(np.asarray(out2), np.asarray(x2 * scale2),
                               rtol=1e-6, atol=1e-6)

    print("KERNEL_OK")
</pallas_src>

<mosaic_0001>
module attributes {stable_mosaic.version = 11 : i64} {
  func.func @scale_kernel(%arg0: i32, %arg1: i32, %arg2: memref<8x128xf32, #tpu.memory_space<vmem>>, %arg3: memref<1x128xf32, #tpu.memory_space<vmem>>, %arg4: memref<8x128xf32, #tpu.memory_space<vmem>>) attributes {dimension_semantics = [#tpu.dimension_semantics<parallel>, #tpu.dimension_semantics<parallel>], iteration_bounds = array<i64: 1, 1>, scalar_prefetch = 0 : i64, scratch_operands = 0 : i64, tpu.core_type = #tpu.core_type<tc>, window_params = [{transform_indices = @transform_0, window_bounds = array<i64: 8, 128>}, {transform_indices = @transform_1, window_bounds = array<i64: 1, 128>}, {transform_indices = @transform_2, window_bounds = array<i64: 8, 128>}]} {
    %c0 = arith.constant 0 : index
    %c0_0 = arith.constant 0 : index
    %0 = vector.load %arg2[%c0, %c0_0] : memref<8x128xf32, #tpu.memory_space<vmem>>, vector<8x128xf32>
    %c0_1 = arith.constant 0 : index
    %c0_2 = arith.constant 0 : index
    %1 = vector.load %arg3[%c0_1, %c0_2] : memref<1x128xf32, #tpu.memory_space<vmem>>, vector<1x128xf32>
    %2 = vector.broadcast %1 : vector<1x128xf32> to vector<8x128xf32>
    %3 = arith.mulf %0, %2 : vector<8x128xf32>
    %c0_3 = arith.constant 0 : index
    %c0_4 = arith.constant 0 : index
    %4 = vector.load %arg4[%c0_3, %c0_4] : memref<8x128xf32, #tpu.memory_space<vmem>>, vector<8x128xf32>
    tpu.vector_store %arg4[%c0_3, %c0_4], %3 {strides = array<i32>} : memref<8x128xf32, #tpu.memory_space<vmem>>, vector<8x128xf32>,
    return
  }
  func.func @transform_0(%arg0: i32, %arg1: i32) -> (i32, i32) {
    %c0_i32 = arith.constant 0 : i32
    return %arg0, %arg1 : i32, i32
  }
  func.func @transform_1(%arg0: i32, %arg1: i32) -> (i32, i32) {
    %c0_i32 = arith.constant 0 : i32
    %c0_i32_0 = arith.constant 0 : i32
    return %c0_i32, %arg1 : i32, i32
  }
  func.func @transform_2(%arg0: i32, %arg1: i32) -> (i32, i32) {
    %c0_i32 = arith.constant 0 : i32
    return %arg0, %arg1 : i32, i32
  }
}

</mosaic_0001>

<bundles_post_ra>
// kernel: tpu_custom_call.1
= control target key start
LH: loop header
LB: loop body
LE: loop exit
PB: predicated region body
PF: predicated region fallthrough
CT: control target
= control target key end

     0   :  { %7 = vsyncpa [#allocation3], 0  ;;  %s144_s0 = inlined_call_operand.hbm [shape: f32[8,128], index: 0, kind: input, shape index: {}]   ;;  %s145_s1 = inlined_call_operand.vmem [shape: f32[1,128], index: 1, kind: input, shape index: {}]   ;;  %s146_s2 = inlined_call_operand.hbm [shape: f32[8,128], index: 2, kind: output, shape index: {}]  }
   0x1   :  { %8 = vsyncpa [#allocation4], 0  ;;  %s100_s9 = smov [#allocation2]   ;;  %s52_s13 = scalar_lea.hbm %s144_s0, 128 }
   0x2   :  { %s15_s10 = sshll.u32 %s100_s9, 4  ;;  %p53_p0 = scmp.ne.s32.totalorder %s144_s0, %s52_s13  ;;  %s16_s10 = int_to_ptr.vmem [resolvable:$true] %s15_s10 }
   0x3   :  { %p56_p1 = scmp.lt.u32.totalorder %s52_s13, %s144_s0 }
   0x5   :  { %p58_p2 = pnand %p56_p1, %p53_p0 }
   0x7   :  { %61 = shalt.err (!%p58_p2)
}
   0x8   :  { %s62_s18 = scalar_lea.vmem %s16_s10, 128  ;;  %p67_p4 = scmp.lt.s32.totalorder %s16_s10, %s16_s10 }
   0x9   :  { %p63_p3 = scmp.ne.s32.totalorder %s16_s10, %s62_s18  ;;  %p68_p5 = scmp.lt.s32.totalorder %s62_s18, %s62_s18 }
   0xb   :  { %p69_p6 = por %p68_p5, %p67_p4 }
   0xd   :  { %p70_p7 = pnand %p69_p6, %p63_p3 }
   0xf   :  { %73 = shalt.err (!%p70_p7)
}
  0x10   :  { %18 = dma.hbm_to_vmem [thread:$0]  %s144_s0, 128, %s16_s10, [#allocation3]  }
  0x11   :  { %96 = dma.done.wait [#allocation3], 128  }
  0x12   :  { %97 = vsyncadd [#allocation3], 4294967168  ;;  %s101_s21 = smov [#allocation5]   ;;  %v24_v0 = vld [vmem:[#allocation2] sm:$0xff] }
  0x13   :  { %s40_s22 = sshll.u32 %s101_s21, 4  ;;  %v49_v1 = vld [vmem:[%s145_s1] ss:$0 sm:$0xff]  ;;  %s41_s22 = int_to_ptr.vmem [resolvable:$true] %s40_s22 }
  0x14   :  { %v32_v2 = vmul.f32 %v49_v1, %v24_v0  ;;  %s74_s25 = scalar_lea.vmem %s41_s22, 128  ;;  %p79_p9 = scmp.lt.s32.totalorder %s41_s22, %s41_s22 }
  0x15   :  { %p75_p8 = scmp.ne.s32.totalorder %s41_s22, %s74_s25  ;;  %p80_p10 = scmp.lt.s32.totalorder %s74_s25, %s74_s25 }
  0x16   :  { %33 = vst [vmem:[#allocation5] sm:$0xff] %v32_v2 }
  0x17   :  { %p81_p11 = por %p80_p10, %p79_p9 }
  0x19   :  { %p82_p12 = pnand %p81_p11, %p75_p8 }
  0x1b   :  { %85 = shalt.err (!%p82_p12)
}
  0x1c   :  { %s86_s27 = scalar_lea.hbm %s146_s2, 128 }
  0x1d   :  { %p87_p13 = scmp.ne.s32.totalorder %s146_s2, %s86_s27  ;;  %p90_p0 = scmp.lt.u32.totalorder %s86_s27, %s146_s2 }
  0x1f   :  { %p92_p1 = pnand %p90_p0, %p87_p13 }
  0x21   :  { %95 = shalt.err (!%p92_p1)
}
  0x22   :  { %43 = dma.vmem_to_hbm [thread:$0]  %s41_s22, 128, %s146_s2, [#allocation4]  }
  0x23   :  { %98 = dma.done.wait [#allocation4], 128  }
  0x24   :  { %99 = vsyncadd [#allocation4], 4294967168 }
  0x25   :  { %47 = vsyncpa [#allocation3], 1 }
  0x26   :  { %48 = vsyncpa [#allocation4], 1 }

</bundles_post_ra>
